<compile_context>
chip_gen: v7x
topology: tpu7x:2x2x1
jax: 0.10.0
libtpu: 0.0.40
codegen_flags: <defaults>
</compile_context>

<pallas_src>
import math

import numpy as np
import jax
import jax.numpy as jnp
from jax import lax
from jax.experimental import pallas as pl
from jax.experimental.pallas import tpu as pltpu  # noqa: F401  (TPU backend assumed)

# ----------------------------- config (small, GQA-consistent) -----------------------------
B = 2             # batch
T = 8             # sequence length
C = 32            # n_embd
H = 4             # n_head
D = C // H        # head_dim = 8
KV = H // 2       # num_key_value_heads = 2 (num_key_value_groups = 2)
HIDDEN = 2 * C    # MLP hidden dim = 64
BT = B * T        # flattened rows = 16
EPS = 1e-5        # nn.LayerNorm default
NEG = -1e30       # finite "minus infinity" (mask stays fp32)

# bf16 weight-slab row offsets (every block starts at lane 0; all offsets 16-row aligned)
W_QKV = 0                   # (C, 3C)        rows [0, 32)
W_O   = C                   # (C, C)         rows [32, 64)
W_12  = 2 * C               # (C, 2*HIDDEN)  rows [64, 96)
W_C   = 3 * C               # (HIDDEN, C)    rows [96, 160)
W_ROWS = 3 * C + HIDDEN     # 160

# fp32 param-slab rows
P_LN1G, P_LN1B, P_LN2G, P_LN2B = 0, 1, 2, 3
P_BQKV, P_BO, P_B12, P_BC = 4, 5, 6, 7
P_BIAS = 8                  # (BT, H*BT) additive causal + same-batch bias
P_HMASK = P_BIAS + BT       # (H*BT, C)  0/1 head-selector (block-diagonal over heads)
P_ROWS = P_HMASK + H * BT   # 88


# ----------------------------------- Pallas kernel ----------------------------------------
def block_kernel(x_ref, w_ref, p_ref, o_ref):
    x = x_ref[...]                                                 # (BT, C) fp32

    # ---- static views into the two packed parameter slabs ----
    ln1g = p_ref[P_LN1G:P_LN1G + 1, 0:C]
    ln1b = p_ref[P_LN1B:P_LN1B + 1, 0:C]
    ln2g = p_ref[P_LN2G:P_LN2G + 1, 0:C]
    ln2b = p_ref[P_LN2B:P_LN2B + 1, 0:C]
    bqkv = p_ref[P_BQKV:P_BQKV + 1, 0:3 * C]
    bo   = p_ref[P_BO:P_BO + 1, 0:C]
    b12  = p_ref[P_B12:P_B12 + 1, 0:2 * HIDDEN]
    bc   = p_ref[P_BC:P_BC + 1, 0:C]
    attn_bias = p_ref[P_BIAS:P_BIAS + BT, 0:H * BT]                # (BT, H*BT) fp32
    head_mask = p_ref[P_HMASK:P_HMASK + H * BT, 0:C]               # (H*BT, C) 0/1 fp32

    wqkv = w_ref[W_QKV:W_QKV + C, 0:3 * C]                         # (C, 3C)       bf16
    wo   = w_ref[W_O:W_O + C, 0:C]                                 # (C, C)        bf16
    w12  = w_ref[W_12:W_12 + C, 0:2 * HIDDEN]                      # (C, 2*HIDDEN) bf16
    wc   = w_ref[W_C:W_C + HIDDEN, 0:C]                            # (HIDDEN, C)   bf16

    def layernorm(v, g, b):                                        # fp32 throughout (v5e VPU)
        mu = jnp.mean(v, axis=-1, keepdims=True)
        var = jnp.mean((v - mu) * (v - mu), axis=-1, keepdims=True)
        return (v - mu) * lax.rsqrt(var + EPS) * g + b

    # ---- ln_1 + fused QKV projection (q pre-scaled by 1/sqrt(D); k/v pre-expanded to H heads)
    x1 = layernorm(x, ln1g, ln1b)
    qkv = jnp.dot(x1.astype(jnp.bfloat16), wqkv,
                  preferred_element_type=jnp.float32) + bqkv        # (BT, 3C)
    q = qkv[:, 0:C]                                                 # (BT, C)
    k = qkv[:, C:2 * C]                                             # (BT, C) per-q-head layout
    v = qkv[:, 2 * C:3 * C]                                         # (BT, C) per-q-head layout

    # ---- GQA causal attention: block-diagonal over heads, two lane-dense 2-D matmuls ----
    kbd = (jnp.tile(k, (H, 1)) * head_mask).astype(jnp.bfloat16)    # (H*BT, C)
    vbd = (jnp.tile(v, (H, 1)) * head_mask).astype(jnp.bfloat16)    # (H*BT, C)
    s = lax.dot_general(q.astype(jnp.bfloat16), kbd,
                        dimension_numbers=(((1,), (1,)), ((), ())),
                        preferred_element_type=jnp.float32)         # (BT, H*BT) fp32
    s = s + attn_bias                                               # causal + same-batch (fp32)
    m = jnp.max(s, axis=-1, keepdims=True)       # row-global max: valid per-head stabilizer
    p = jnp.exp(s - m)                           # masked entries -> exp(~-1e30) == 0
    # per-head softmax denominator broadcast over that head's D lanes (exact fp32 matmul)
    denom = jnp.dot(p, head_mask, preferred_element_type=jnp.float32)        # (BT, C)
    ctx = jnp.dot(p.astype(jnp.bfloat16), vbd,
                  preferred_element_type=jnp.float32)                        # (BT, C), head-major
    ctx = ctx / denom                                                        # exact divide
    attn = jnp.dot(ctx.astype(jnp.bfloat16), wo,
                   preferred_element_type=jnp.float32) + bo
    x = x + attn                                                             # residual 1

    # ---- ln_2 + fused SwiGLU MLP (gate|up packed -> 128-lane output) ----
    x2 = layernorm(x, ln2g, ln2b)
    h12 = jnp.dot(x2.astype(jnp.bfloat16), w12,
                  preferred_element_type=jnp.float32) + b12                  # (BT, 2*HIDDEN)
    h1 = h12[:, 0:HIDDEN]
    h2 = h12[:, HIDDEN:2 * HIDDEN]
    hidden = h1 * lax.logistic(h1) * h2                                      # silu(h1)*h2, fp32
    mlp = jnp.dot(hidden.astype(jnp.bfloat16), wc,
                  preferred_element_type=jnp.float32) + bc
    o_ref[...] = x + mlp                                                     # residual 2


# ----------------------------------- wrapper -----------------------------------------------
def block_forward(x, wslab, pslab):
    x2d = x.reshape(BT, C)
    out2d = pl.pallas_call(
        block_kernel,
        out_shape=jax.ShapeDtypeStruct((BT, C), jnp.float32),
    )(x2d, wslab, pslab)
    return out2d.reshape(B, T, C)


# -------------------------------- parameter init / packing ---------------------------------
def xavier_uniform(key, fan_in, fan_out):
    bound = math.sqrt(6.0 / (fan_in + fan_out))
    return jax.random.uniform(key, (fan_in, fan_out), jnp.float32, -bound, bound)


def make_params(key):
    ks = jax.random.split(key, 16)
    ln1_g = jnp.ones((1, C), jnp.float32)
    ln1_b = jnp.zeros((1, C), jnp.float32)
    ln2_g = jnp.ones((1, C), jnp.float32)
    ln2_b = jnp.zeros((1, C), jnp.float32)

    # attention projections (xavier-uniform weights, zero biases, per _reset_parameters)
    wq = xavier_uniform(ks[0], C, C);        bq = jnp.zeros((1, C), jnp.float32)
    wk = xavier_uniform(ks[1], C, C // 2);   bk = jnp.zeros((1, C // 2), jnp.float32)
    wv = xavier_uniform(ks[2], C, C // 2);   bv = jnp.zeros((1, C // 2), jnp.float32)
    wo = xavier_uniform(ks[3], C, C);        bo = jnp.zeros((1, C), jnp.float32)

    # MLP (PyTorch-default-style small uniform init)
    def lin(kw, kb, fi, fo):
        bnd = 1.0 / math.sqrt(fi)
        w = jax.random.uniform(kw, (fi, fo), jnp.float32, -bnd, bnd)
        b = jax.random.uniform(kb, (1, fo), jnp.float32, -bnd, bnd)
        return w, b

    w1, b1 = lin(ks[4], ks[5], C, HIDDEN)
    w2, b2 = lin(ks[6], ks[7], C, HIDDEN)
    wc, bc = lin(ks[8], ks[9], HIDDEN, C)

    return [ln1_g, ln1_b, wq, bq, wk, bk, wv, bv, wo, bo,
            ln2_g, ln2_b, w1, b1, w2, b2, wc, bc]


def pack_params(params):
    """One-time host-side packing into two slabs:
       * bf16 weight slab (W_ROWS, 128): [q*1/sqrt(D) | k expanded | v expanded], wo, w1|w2, wc.
         GQA expansion folds q head h -> kv head h % KV (this module's _repeat_kv) into the weight.
       * fp32 param slab (P_ROWS, 128): LN gammas/betas, biases, the additive causal+same-batch
         attention bias (BT, H*BT), and the 0/1 head-selector matrix (H*BT, C)."""
    (ln1g, ln1b, wq, bq, wk, bk, wv, bv, wo, bo,
     ln2g, ln2b, w1, b1, w2, b2, wc, bc) = [np.asarray(p, np.float32) for p in params]
    scale = 1.0 / math.sqrt(D)

    # fused + expanded QKV: columns [q (C) | kv0 kv1 kv0 kv1 (C) | same for v (C)]
    wqkv = np.concatenate([wq * scale, wk, wk, wv, wv], axis=1)          # (C, 3C)
    bqkv = np.concatenate([bq * scale, bk, bk, bv, bv], axis=1)          # (1, 3C)
    w12 = np.concatenate([w1, w2], axis=1)                               # (C, 2*HIDDEN)
    b12 = np.concatenate([b1, b2], axis=1)                               # (1, 2*HIDDEN)

    wslab = np.zeros((W_ROWS, 128), np.float32)
    wslab[W_QKV:W_QKV + C, 0:3 * C] = wqkv
    wslab[W_O:W_O + C, 0:C] = wo
    wslab[W_12:W_12 + C, 0:2 * HIDDEN] = w12
    wslab[W_C:W_C + HIDDEN, 0:C] = wc

    pslab = np.zeros((P_ROWS, 128), np.float32)
    pslab[P_LN1G, 0:C] = ln1g[0]
    pslab[P_LN1B, 0:C] = ln1b[0]
    pslab[P_LN2G, 0:C] = ln2g[0]
    pslab[P_LN2B, 0:C] = ln2b[0]
    pslab[P_BQKV, 0:3 * C] = bqkv[0]
    pslab[P_BO, 0:C] = bo[0]
    pslab[P_B12, 0:2 * HIDDEN] = b12[0]
    pslab[P_BC, 0:C] = bc[0]

    # additive attention bias: 0 where (same batch AND key pos <= query pos), else NEG
    r = np.arange(BT)
    allowed = (r[:, None] // T == r[None, :] // T) & (r[None, :] <= r[:, None])
    bias_tt = np.where(allowed, 0.0, NEG).astype(np.float32)             # (BT, BT)
    pslab[P_BIAS:P_BIAS + BT, 0:H * BT] = np.tile(bias_tt, (1, H))       # (BT, H*BT)

    # head-selector: head_mask[h*BT + t, c] = 1 iff channel c belongs to head h
    jj = np.arange(H * BT)
    cc = np.arange(C)
    pslab[P_HMASK:P_HMASK + H * BT, 0:C] = (cc[None, :] // D == jj[:, None] // BT).astype(np.float32)

    return jnp.asarray(wslab, jnp.bfloat16), jnp.asarray(pslab, jnp.float32)


# ------------------------------ pure-JAX reference (for sanity) ----------------------------
def block_reference(x, params):
    (ln1g, ln1b, wq, bq, wk, bk, wv, bv, wo, bo,
     ln2g, ln2b, w1, b1, w2, b2, wc, bc) = params

    def ln(v, g, b):
        mu = v.mean(-1, keepdims=True)
        var = ((v - mu) ** 2).mean(-1, keepdims=True)
        return (v - mu) / jnp.sqrt(var + EPS) * g + b

    x1 = ln(x, ln1g, ln1b)
    q = (x1 @ wq + bq).reshape(B, T, H, D)
    k = (x1 @ wk + bk).reshape(B, T, KV, D)
    v = (x1 @ wv + bv).reshape(B, T, KV, D)
    # this module's _repeat_kv (unsqueeze(2)+expand+reshape): q head h -> kv head h % KV
    k = jnp.concatenate([k, k], axis=2)
    v = jnp.concatenate([v, v], axis=2)
    q, k, v = (jnp.transpose(a, (0, 2, 1, 3)) for a in (q, k, v))  # (B,H,T,D)
    s = jnp.einsum('bhqd,bhkd->bhqk', q, k) / math.sqrt(D)
    mask = jnp.tril(jnp.ones((T, T), bool))
    s = jnp.where(mask, s, -jnp.inf)
    p = jax.nn.softmax(s, axis=-1)
    o = jnp.einsum('bhqk,bhkd->bhqd', p, v)
    o = jnp.transpose(o, (0, 2, 1, 3)).reshape(B, T, C)
    x = x + (o @ wo + bo)
    x2 = ln(x, ln2g, ln2b)
    hidden = jax.nn.silu(x2 @ w1 + b1) * (x2 @ w2 + b2)
    return x + (hidden @ wc + bc)


# ------------------------------------------ main -------------------------------------------
if __name__ == "__main__":
    key = jax.random.PRNGKey(0)
    kx, kp = jax.random.split(key)
    x = jax.random.normal(kx, (B, T, C), jnp.float32)
    params = make_params(kp)
    wslab, pslab = pack_params(params)

    out = block_forward(x, wslab, pslab)
    out = jax.block_until_ready(out)

    ref = block_reference(x, params)
    # bf16 MXU operands (fp32 accumulation) -> compare against fp32 reference at bf16 tolerance
    assert jnp.allclose(out, ref, atol=5e-2, rtol=5e-2), "mismatch vs reference"

    print("KERNEL_OK")
</pallas_src>

<mosaic_0001>
module attributes {stable_mosaic.version = 11 : i64} {
  func.func @block_kernel(%arg0: memref<16x32xf32, #tpu.memory_space<vmem>>, %arg1: memref<160x128xbf16, #tpu.memory_space<vmem>>, %arg2: memref<88x128xf32, #tpu.memory_space<vmem>>, %arg3: memref<16x32xf32, #tpu.memory_space<vmem>>) attributes {dimension_semantics = [], scalar_prefetch = 0 : i64, scratch_operands = 0 : i64, tpu.core_type = #tpu.core_type<tc>} {
    %c0 = arith.constant 0 : index
    %c0_0 = arith.constant 0 : index
    %0 = vector.load %arg0[%c0, %c0_0] : memref<16x32xf32, #tpu.memory_space<vmem>>, vector<16x32xf32>
    %c0_1 = arith.constant 0 : index
    %c0_2 = arith.constant 0 : index
    %1 = vector.load %arg2[%c0_1, %c0_2] : memref<88x128xf32, #tpu.memory_space<vmem>>, vector<1x32xf32>
    %c1 = arith.constant 1 : index
    %c0_3 = arith.constant 0 : index
    %2 = vector.load %arg2[%c1, %c0_3] : memref<88x128xf32, #tpu.memory_space<vmem>>, vector<1x32xf32>
    %c2 = arith.constant 2 : index
    %c0_4 = arith.constant 0 : index
    %3 = vector.load %arg2[%c2, %c0_4] : memref<88x128xf32, #tpu.memory_space<vmem>>, vector<1x32xf32>
    %c3 = arith.constant 3 : index
    %c0_5 = arith.constant 0 : index
    %4 = vector.load %arg2[%c3, %c0_5] : memref<88x128xf32, #tpu.memory_space<vmem>>, vector<1x32xf32>
    %c4 = arith.constant 4 : index
    %c0_6 = arith.constant 0 : index
    %5 = vector.load %arg2[%c4, %c0_6] : memref<88x128xf32, #tpu.memory_space<vmem>>, vector<1x96xf32>
    %c5 = arith.constant 5 : index
    %c0_7 = arith.constant 0 : index
    %6 = vector.load %arg2[%c5, %c0_7] : memref<88x128xf32, #tpu.memory_space<vmem>>, vector<1x32xf32>
    %c6 = arith.constant 6 : index
    %c0_8 = arith.constant 0 : index
    %7 = vector.load %arg2[%c6, %c0_8] : memref<88x128xf32, #tpu.memory_space<vmem>>, vector<1x128xf32>
    %c7 = arith.constant 7 : index
    %c0_9 = arith.constant 0 : index
    %8 = vector.load %arg2[%c7, %c0_9] : memref<88x128xf32, #tpu.memory_space<vmem>>, vector<1x32xf32>
    %c8 = arith.constant 8 : index
    %c0_10 = arith.constant 0 : index
    %9 = vector.load %arg2[%c8, %c0_10] : memref<88x128xf32, #tpu.memory_space<vmem>>, vector<16x64xf32>
    %c24 = arith.constant 24 : index
    %c0_11 = arith.constant 0 : index
    %10 = vector.load %arg2[%c24, %c0_11] : memref<88x128xf32, #tpu.memory_space<vmem>>, vector<64x32xf32>
    %c0_12 = arith.constant 0 : index
    %c0_13 = arith.constant 0 : index
    %11 = vector.load %arg1[%c0_12, %c0_13] : memref<160x128xbf16, #tpu.memory_space<vmem>>, vector<32x96xbf16>
    %c32 = arith.constant 32 : index
    %c0_14 = arith.constant 0 : index
    %12 = vector.load %arg1[%c32, %c0_14] : memref<160x128xbf16, #tpu.memory_space<vmem>>, vector<32x32xbf16>
    %c64 = arith.constant 64 : index
    %c0_15 = arith.constant 0 : index
    %13 = vector.load %arg1[%c64, %c0_15] : memref<160x128xbf16, #tpu.memory_space<vmem>>, vector<32x128xbf16>
    %c96 = arith.constant 96 : index
    %c0_16 = arith.constant 0 : index
    %14 = vector.load %arg1[%c96, %c0_16] : memref<160x128xbf16, #tpu.memory_space<vmem>>, vector<64x32xbf16>
    %cst = arith.constant dense<0.000000e+00> : vector<16xf32>
    %15 = vector.multi_reduction <add>, %0, %cst [1] : vector<16x32xf32> to vector<16xf32>
    %16 = vector.shape_cast %15 : vector<16xf32> to vector<16x1xf32>
    %cst_17 = arith.constant 3.200000e+01 : f32
    %17 = vector.broadcast %cst_17 : f32 to vector<16x1xf32>
    %18 = arith.divf %16, %17 : vector<16x1xf32>
    %19 = vector.broadcast %18 : vector<16x1xf32> to vector<16x32xf32>
    %20 = arith.subf %0, %19 : vector<16x32xf32>
    %21 = vector.broadcast %18 : vector<16x1xf32> to vector<16x32xf32>
    %22 = arith.subf %0, %21 : vector<16x32xf32>
    %23 = arith.mulf %20, %22 : vector<16x32xf32>
    %cst_18 = arith.constant dense<0.000000e+00> : vector<16xf32>
    %24 = vector.multi_reduction <add>, %23, %cst_18 [1] : vector<16x32xf32> to vector<16xf32>
    %25 = vector.shape_cast %24 : vector<16xf32> to vector<16x1xf32>
    %cst_19 = arith.constant 3.200000e+01 : f32
    %26 = vector.broadcast %cst_19 : f32 to vector<16x1xf32>
    %27 = arith.divf %25, %26 : vector<16x1xf32>
    %28 = vector.broadcast %18 : vector<16x1xf32> to vector<16x32xf32>
    %29 = arith.subf %0, %28 : vector<16x32xf32>
    %cst_20 = arith.constant 9.99999974E-6 : f32
    %30 = vector.broadcast %cst_20 : f32 to vector<16x1xf32>
    %31 = arith.addf %27, %30 : vector<16x1xf32>
    %32 = math.rsqrt %31 : vector<16x1xf32>
    %33 = vector.broadcast %32 : vector<16x1xf32> to vector<16x32xf32>
    %34 = arith.mulf %29, %33 : vector<16x32xf32>
    %35 = vector.broadcast %1 : vector<1x32xf32> to vector<16x32xf32>
    %36 = arith.mulf %34, %35 : vector<16x32xf32>
    %37 = vector.broadcast %2 : vector<1x32xf32> to vector<16x32xf32>
    %38 = arith.addf %36, %37 : vector<16x32xf32>
    %39 = arith.truncf %38 : vector<16x32xf32> to vector<16x32xbf16>
    %cst_21 = arith.constant dense<0.000000e+00> : vector<16x96xf32>
    %40 = tpu.matmul %39, %11, %cst_21 {dimension_numbers = #tpu.dot_dimension_numbers<[1], [0], [0], [1], [0, 0, 1, 1], [], []>} : vector<16x32xbf16>, vector<32x96xbf16>, vector<16x96xf32> -> vector<16x96xf32>
    %41 = vector.broadcast %5 : vector<1x96xf32> to vector<16x96xf32>
    %42 = arith.addf %40, %41 : vector<16x96xf32>
    %43 = vector.extract_strided_slice %42 {offsets = [0, 0], sizes = [16, 32], strides = [1, 1]} : vector<16x96xf32> to vector<16x32xf32>
    %44 = vector.extract_strided_slice %42 {offsets = [0, 32], sizes = [16, 32], strides = [1, 1]} : vector<16x96xf32> to vector<16x32xf32>
    %45 = vector.extract_strided_slice %42 {offsets = [0, 64], sizes = [16, 32], strides = [1, 1]} : vector<16x96xf32> to vector<16x32xf32>
    %46 = tpu.concatenate %44, %44, %44, %44 in 0 : vector<16x32xf32>, vector<16x32xf32>, vector<16x32xf32>, vector<16x32xf32> -> vector<64x32xf32>
    %47 = arith.mulf %46, %10 : vector<64x32xf32>
    %48 = arith.truncf %47 : vector<64x32xf32> to vector<64x32xbf16>
    %49 = tpu.concatenate %45, %45, %45, %45 in 0 : vector<16x32xf32>, vector<16x32xf32>, vector<16x32xf32>, vector<16x32xf32> -> vector<64x32xf32>
    %50 = arith.mulf %49, %10 : vector<64x32xf32>
    %51 = arith.truncf %50 : vector<64x32xf32> to vector<64x32xbf16>
    %52 = arith.truncf %43 : vector<16x32xf32> to vector<16x32xbf16>
    %cst_22 = arith.constant dense<0.000000e+00> : vector<16x64xf32>
    %53 = tpu.matmul %52, %48, %cst_22 {dimension_numbers = #tpu.dot_dimension_numbers<[1], [1], [0], [0], [0, 0, 1, 0], [], []>} : vector<16x32xbf16>, vector<64x32xbf16>, vector<16x64xf32> -> vector<16x64xf32>
    %54 = arith.addf %53, %9 : vector<16x64xf32>
    %cst_23 = arith.constant dense<0xFF800000> : vector<16xf32>
    %55 = vector.multi_reduction <maximumf>, %54, %cst_23 [1] : vector<16x64xf32> to vector<16xf32>
    %56 = vector.shape_cast %55 : vector<16xf32> to vector<16x1xf32>
    %57 = vector.broadcast %56 : vector<16x1xf32> to vector<16x64xf32>
    %58 = arith.subf %54, %57 : vector<16x64xf32>
    %59 = math.exp %58 : vector<16x64xf32>
    %cst_24 = arith.constant dense<0.000000e+00> : vector<16x32xf32>
    %60 = tpu.matmul %59, %10, %cst_24 {dimension_numbers = #tpu.dot_dimension_numbers<[1], [0], [0], [1], [0, 0, 1, 1], [], []>} : vector<16x64xf32>, vector<64x32xf32>, vector<16x32xf32> -> vector<16x32xf32>
    %61 = arith.truncf %59 : vector<16x64xf32> to vector<16x64xbf16>
    %cst_25 = arith.constant dense<0.000000e+00> : vector<16x32xf32>
    %62 = tpu.matmul %61, %51, %cst_25 {dimension_numbers = #tpu.dot_dimension_numbers<[1], [0], [0], [1], [0, 0, 1, 1], [], []>} : vector<16x64xbf16>, vector<64x32xbf16>, vector<16x32xf32> -> vector<16x32xf32>
    %63 = arith.divf %62, %60 : vector<16x32xf32>
    %64 = arith.truncf %63 : vector<16x32xf32> to vector<16x32xbf16>
    %cst_26 = arith.constant dense<0.000000e+00> : vector<16x32xf32>
    %65 = tpu.matmul %64, %12, %cst_26 {dimension_numbers = #tpu.dot_dimension_numbers<[1], [0], [0], [1], [0, 0, 1, 1], [], []>} : vector<16x32xbf16>, vector<32x32xbf16>, vector<16x32xf32> -> vector<16x32xf32>
    %66 = vector.broadcast %6 : vector<1x32xf32> to vector<16x32xf32>
    %67 = arith.addf %65, %66 : vector<16x32xf32>
    %68 = arith.addf %0, %67 : vector<16x32xf32>
    %cst_27 = arith.constant dense<0.000000e+00> : vector<16xf32>
    %69 = vector.multi_reduction <add>, %68, %cst_27 [1] : vector<16x32xf32> to vector<16xf32>
    %70 = vector.shape_cast %69 : vector<16xf32> to vector<16x1xf32>
    %cst_28 = arith.constant 3.200000e+01 : f32
    %71 = vector.broadcast %cst_28 : f32 to vector<16x1xf32>
    %72 = arith.divf %70, %71 : vector<16x1xf32>
    %73 = vector.broadcast %72 : vector<16x1xf32> to vector<16x32xf32>
    %74 = arith.subf %68, %73 : vector<16x32xf32>
    %75 = vector.broadcast %72 : vector<16x1xf32> to vector<16x32xf32>
    %76 = arith.subf %68, %75 : vector<16x32xf32>
    %77 = arith.mulf %74, %76 : vector<16x32xf32>
    %cst_29 = arith.constant dense<0.000000e+00> : vector<16xf32>
    %78 = vector.multi_reduction <add>, %77, %cst_29 [1] : vector<16x32xf32> to vector<16xf32>
    %79 = vector.shape_cast %78 : vector<16xf32> to vector<16x1xf32>
    %cst_30 = arith.constant 3.200000e+01 : f32
    %80 = vector.broadcast %cst_30 : f32 to vector<16x1xf32>
    %81 = arith.divf %79, %80 : vector<16x1xf32>
    %82 = vector.broadcast %72 : vector<16x1xf32> to vector<16x32xf32>
    %83 = arith.subf %68, %82 : vector<16x32xf32>
    %cst_31 = arith.constant 9.99999974E-6 : f32
    %84 = vector.broadcast %cst_31 : f32 to vector<16x1xf32>
    %85 = arith.addf %81, %84 : vector<16x1xf32>
    %86 = math.rsqrt %85 : vector<16x1xf32>
    %87 = vector.broadcast %86 : vector<16x1xf32> to vector<16x32xf32>
    %88 = arith.mulf %83, %87 : vector<16x32xf32>
    %89 = vector.broadcast %3 : vector<1x32xf32> to vector<16x32xf32>
    %90 = arith.mulf %88, %89 : vector<16x32xf32>
    %91 = vector.broadcast %4 : vector<1x32xf32> to vector<16x32xf32>
    %92 = arith.addf %90, %91 : vector<16x32xf32>
    %93 = arith.truncf %92 : vector<16x32xf32> to vector<16x32xbf16>
    %cst_32 = arith.constant dense<0.000000e+00> : vector<16x128xf32>
    %94 = tpu.matmul %93, %13, %cst_32 {dimension_numbers = #tpu.dot_dimension_numbers<[1], [0], [0], [1], [0, 0, 1, 1], [], []>} : vector<16x32xbf16>, vector<32x128xbf16>, vector<16x128xf32> -> vector<16x128xf32>
    %95 = vector.broadcast %7 : vector<1x128xf32> to vector<16x128xf32>
    %96 = arith.addf %94, %95 : vector<16x128xf32>
    %97 = vector.extract_strided_slice %96 {offsets = [0, 0], sizes = [16, 64], strides = [1, 1]} : vector<16x128xf32> to vector<16x64xf32>
    %98 = vector.extract_strided_slice %96 {offsets = [0, 64], sizes = [16, 64], strides = [1, 1]} : vector<16x128xf32> to vector<16x64xf32>
    %99 = arith.negf %97 : vector<16x64xf32>
    %100 = math.exp %99 : vector<16x64xf32>
    %cst_33 = arith.constant 1.000000e+00 : f32
    %101 = vector.broadcast %cst_33 : f32 to vector<16x64xf32>
    %102 = arith.addf %101, %100 : vector<16x64xf32>
    %103 = arith.divf %101, %102 : vector<16x64xf32>
    %104 = arith.mulf %97, %103 : vector<16x64xf32>
    %105 = arith.mulf %104, %98 : vector<16x64xf32>
    %106 = arith.truncf %105 : vector<16x64xf32> to vector<16x64xbf16>
    %cst_34 = arith.constant dense<0.000000e+00> : vector<16x32xf32>
    %107 = tpu.matmul %106, %14, %cst_34 {dimension_numbers = #tpu.dot_dimension_numbers<[1], [0], [0], [1], [0, 0, 1, 1], [], []>} : vector<16x64xbf16>, vector<64x32xbf16>, vector<16x32xf32> -> vector<16x32xf32>
    %108 = vector.broadcast %8 : vector<1x32xf32> to vector<16x32xf32>
    %109 = arith.addf %107, %108 : vector<16x32xf32>
    %110 = arith.addf %68, %109 : vector<16x32xf32>
    %c0_35 = arith.constant 0 : index
    %c0_36 = arith.constant 0 : index
    %111 = vector.load %arg3[%c0_35, %c0_36] : memref<16x32xf32, #tpu.memory_space<vmem>>, vector<16x32xf32>
    tpu.vector_store %arg3[%c0_35, %c0_36], %110 {strides = array<i32>} : memref<16x32xf32, #tpu.memory_space<vmem>>, vector<16x32xf32>,
    return
  }
}

</mosaic_0001>

<bundles_post_ra>
// kernel: tpu_custom_call.1
= control target key start
LH: loop header
LB: loop body
LE: loop exit
PB: predicated region body
PF: predicated region fallthrough
CT: control target
= control target key end

     0   :  { %8 = vsyncpa [#allocation3], 0  ;;  %s1325_s0 = inlined_call_operand.hbm [shape: f32[16,32], index: 0, kind: input, shape index: {}]   ;;  %s1326_s1 = inlined_call_operand.hbm [shape: bf16[160,128], index: 1, kind: input, shape index: {}]   ;;  %s1327_s2 = inlined_call_operand.hbm [shape: f32[88,128], index: 2, kind: input, shape index: {}]   ;;  %s1328_s3 = inlined_call_operand.hbm [shape: f32[16,32], index: 3, kind: output, shape index: {}]  }
   0x1   :  { %9 = vsyncpa [#allocation6], 0 }
   0x2   :  { %10 = vsyncpa [#allocation4], 0  ;;  %s1084_s12 = smov [#allocation5]   ;;  %s990_s16 = scalar_lea.hbm %s1326_s1, 1280 }
   0x3   :  { %s28_s13 = sshll.u32 %s1084_s12, 4  ;;  %p991_p0 = scmp.ne.s32.totalorder %s1326_s1, %s990_s16  ;;  %s29_s13 = int_to_ptr.vmem [resolvable:$true] %s28_s13 }
   0x4   :  { %p994_p1 = scmp.lt.u32.totalorder %s990_s16, %s1326_s1 }
   0x6   :  { %p996_p2 = pnand %p994_p1, %p991_p0 }
   0x8   :  { %999 = shalt.err (!%p996_p2)
}
   0x9   :  { %s1000_s21 = scalar_lea.vmem %s29_s13, 1280  ;;  %p1005_p4 = scmp.lt.s32.totalorder %s29_s13, %s29_s13 }
   0xa   :  { %p1001_p3 = scmp.ne.s32.totalorder %s29_s13, %s1000_s21  ;;  %p1006_p5 = scmp.lt.s32.totalorder %s1000_s21, %s1000_s21 }
   0xc   :  { %p1007_p6 = por %p1006_p5, %p1005_p4 }
   0xe   :  { %p1008_p7 = pnand %p1007_p6, %p1001_p3 }
  0x10   :  { %1011 = shalt.err (!%p1008_p7)
}
  0x11   :  { %s1085_s22 = smov 64   ;;  %s1086_s23 = smov 4  }
  0x12   :  { %34 = dma.hbm_to_vmem [thread:$0]  %s1326_s1, 1280, %s29_s13, [#allocation6], %s1085_s22, %s1085_s22, %s1086_s23  }
  0x13   :  { %s1087_s26 = smov [#allocation2]   ;;  %s1012_s30 = scalar_lea.hbm %s1325_s0, 256 }
  0x14   :  { %s16_s27 = sshll.u32 %s1087_s26, 4  ;;  %p1013_p8 = scmp.ne.s32.totalorder %s1325_s0, %s1012_s30  ;;  %s17_s27 = int_to_ptr.vmem [resolvable:$true] %s16_s27 }
  0x15   :  { %p1016_p9 = scmp.lt.u32.totalorder %s1012_s30, %s1325_s0 }
  0x17   :  { %p1018_p10 = pnand %p1016_p9, %p1013_p8 }
  0x19   :  { %1021 = shalt.err (!%p1018_p10)
}
  0x1a   :  { %s1022_s8 = scalar_lea.vmem %s17_s27, 256  ;;  %p1027_p12 = scmp.lt.s32.totalorder %s17_s27, %s17_s27 }
  0x1b   :  { %p1023_p11 = scmp.ne.s32.totalorder %s17_s27, %s1022_s8  ;;  %p1028_p13 = scmp.lt.s32.totalorder %s1022_s8, %s1022_s8 }
  0x1d   :  { %p1029_p0 = por %p1028_p13, %p1027_p12 }
  0x1f   :  { %p1030_p1 = pnand %p1029_p0, %p1023_p11 }
  0x21   :  { %1033 = shalt.err (!%p1030_p1)
}
  0x22   :  { %s1088_s1 = smov 128   ;;  %s1089_s9 = smov 8  }
  0x23   :  { %22 = dma.hbm_to_vmem [thread:$0]  %s1325_s0, 256, %s17_s27, [#allocation3], %s1088_s1, %s1088_s1, %s1089_s9  }
  0x24   :  { %s1090_s12 = smov [#allocation7]   ;;  %s1034_s16 = scalar_lea.hbm %s1327_s2, 1408 }
  0x25   :  { %s40_s13 = sshll.u32 %s1090_s12, 4  ;;  %p1035_p2 = scmp.ne.s32.totalorder %s1327_s2, %s1034_s16  ;;  %s41_s13 = int_to_ptr.vmem [resolvable:$true] %s40_s13 }
  0x26   :  { %p1038_p3 = scmp.lt.u32.totalorder %s1034_s16, %s1327_s2 }
  0x28   :  { %p1040_p4 = pnand %p1038_p3, %p1035_p2 }
  0x2a   :  { %1043 = shalt.err (!%p1040_p4)
}
  0x2b   :  { %s1044_s21 = scalar_lea.vmem %s41_s13, 1408  ;;  %p1049_p6 = scmp.lt.s32.totalorder %s41_s13, %s41_s13 }
  0x2c   :  { %p1045_p5 = scmp.ne.s32.totalorder %s41_s13, %s1044_s21  ;;  %p1050_p7 = scmp.lt.s32.totalorder %s1044_s21, %s1044_s21 }
  0x2e   :  { %p1051_p8 = por %p1050_p7, %p1049_p6 }
  0x30   :  { %p1052_p9 = pnand %p1051_p8, %p1045_p5 }
  0x32   :  { %1055 = shalt.err (!%p1052_p9)
}
  0x33   :  { %46 = dma.hbm_to_vmem [thread:$0]  %s1327_s2, 1408, %s41_s13, [#allocation6], %s1088_s1, %s1088_s1, %s1089_s9  }
  0x34   :  { %1078 = dma.done.wait [#allocation3], 256  }
  0x35   :  { %1079 = vsyncadd [#allocation3], 4294967040 }
  0x36   :  { %1080 = dma.done.wait [#allocation6], 2688  }
  0x37   :  { %1081 = vsyncadd [#allocation6], 4294964608  ;;  %vm97_vm0 = vcmask 261120   ;;  %v1160_v0 = vld [vmem:[#allocation2] sm:$0xff]  ;;  %v1162_v1 = vld [vmem:[#allocation2 + $0x8] sm:$0xff]  ;;  %v1091_v15 = vmov 0.0  }
  0x38   :  { %v98_v2 = vsel %vm97_vm0, %v1160_v0, 0.0  ;;  %v101_v3 = vsel %vm97_vm0, %v1162_v1, 0.0  ;;  %v956_v14 = vld [vmem:[#allocation5] sm:$0xff]   ;;  %849 = vmatprep.subr.bf16.mxu0 %v1091_v15  ;;  %857 = vmatprep.subr.bf16.mxu1 %v1091_v15  ;;  %v957_v16 = vld [vmem:[#allocation5 + $0x8] sm:$0xff]   ;;  %vm1092_vm1 = vmmov 0   ;;  %v1179_v17 = vld [vmem:[#allocation7 + $0x20] sm:$0xff] }
  0x39   :  { %99 = vadd.xlane.f32.xlu0 %v98_v2  ;;  %850 = vmatpush3.bf16.msra.mxu0 %v956_v14  ;;  %v1181_v18 = vld [vmem:[#allocation7 + $0x18] sm:$0xff]  ;;  %s1093_s2 = smov 32   ;;  %v1185_v19 = vld [vmem:[#allocation7 + $0x28] sm:$0xff]  ;;  %v1191_v21 = vld [vmem:[#allocation7 + $0x30] sm:$0xff]  ;;  %s1094_s24 = smov 96   ;;  %vm347_vm2 = vcmask 523264  }
  0x3a   :  { %853 = vmatprep.mubr.msk.bf16.mxu0 %vm1092_vm1, %v1091_v15  ;;  %851 = vmatprep.subr.bf16.mxu0 %v1091_v15  ;;  %v1187_v20 = vld [vmem:[#allocation7 + $0x38] sm:$0xff]  ;;  %v1193_v22 = vld [vmem:[#allocation7 + $0x48] sm:$0xff]  ;;  %v1197_v23 = vld [vmem:[#allocation7 + $0x40] sm:$0xff] }
  0x3b   :  { %865 = vmatprep.mubr.msk.bf16.mxu1 %vm1092_vm1, %v1091_v15  ;;  %v1200_v24 = vld [vmem:[#allocation7 + $0x50] sm:$0xff]  ;;  %v787_v33 = vld [vmem:[#allocation7] ss:$0 sm:$0xff]  ;;  %v788_v37 = vld [vmem:[#allocation7 + $0x1] ss:$0 sm:$0xff] }
  0x3c   :  { %v789_v46 = vld [vmem:[#allocation7 + $0x4] ss:$0 sm:$0xff] }
  0x3d   :  { %102 = vadd.xlane.f32.xlu0 %v101_v3  ;;  %852 = vmatpush3.bf16.msra.mxu0 %v957_v16 }
  0x53   :  { %206 = vrot.lane.b32.xlu0 %v1181_v18, %s1093_s2 }
  0x57   :  { %214 = vrot.lane.b32.xlu0 %v1187_v20, %s1093_s2 }
  0x5b   :  { %218 = vrot.lane.b32.xlu0 %v1193_v22, %s1093_s2 }
  0xc6   :  { %v100_v4 = vpop.xlane.xlu0 %99 }
  0xc7   :  { %v105_v5 = vmul.f32 0.03125, %v100_v4 }
  0xc9   :  { %v107_v6 = vsub.f32 %v1160_v0, %v105_v5 }
  0xca   :  { %v103_v7 = vpop.xlane.xlu0 %102 }
  0xcb   :  { %v106_v8 = vmul.f32 0.03125, %v103_v7  ;;  %v109_v9 = vmul.f32 %v107_v6, %v107_v6 }
  0xcd   :  { %v108_v10 = vsub.f32 %v1162_v1, %v106_v8  ;;  %v111_v11 = vsel %vm97_vm0, %v109_v9, 0.0 }
  0xce   :  { %112 = vadd.xlane.f32.xlu1 %v111_v11  ;;  %v207_v45 = vpop.permute.xlu0 %206 }
  0xcf   :  { %v110_v12 = vmul.f32 %v108_v10, %v108_v10 }
  0xd1   :  { %v114_v13 = vsel %vm97_vm0, %v110_v12, 0.0 }
  0xd2   :  { %115 = vadd.xlane.f32.xlu1 %v114_v13  ;;  %v215_v48 = vpop.permute.xlu0 %214 }
  0xd6   :  { %v219_v60 = vpop.permute.xlu0 %218 }
  0xe3   :  { %208 = vrot.lane.b32.xlu1 %v1179_v17, %s1093_s2 }
  0xe7   :  { %210 = vrot.lane.b32.xlu1 %v1185_v19, %s1093_s2 }
  0xeb   :  { %212 = vrot.lane.b32.xlu1 %v1191_v21, %s1093_s2 }
  0xef   :  { %216 = vrot.lane.b32.xlu1 %v1197_v23, %s1093_s2 }
  0xf3   :  { %220 = vrot.lane.b32.xlu1 %v1200_v24, %s1093_s2 }
 0x15b   :  { %v113_v25 = vpop.xlane.xlu1 %112 }
 0x15c   :  { %v117_v26 = vmul.f32 0.03125, %v113_v25  ;;  %v67_v25 = vld [vmem:[#allocation7 + $0x8] sm:$0xff] }
 0x15e   :  { %v119_v27 = vadd.f32 1e-05, %v117_v26 }
 0x15f   :  { %v116_v28 = vpop.xlane.xlu1 %115 }
 0x160   :  { %966 = vrsqrt.f32 %v119_v27  ;;  %v118_v29 = vmul.f32 0.03125, %v116_v28 }
 0x162   :  { %v120_v30 = vadd.f32 1e-05, %v118_v29  ;;  %v68_v29 = vld [vmem:[#allocation7 + $0x10] sm:$0xff] }
 0x163   :  { %v209_v42 = vpop.permute.xlu1 %208 }
 0x164   :  { %968 = vrsqrt.f32 %v120_v30 }
 0x167   :  { %v211_v43 = vpop.permute.xlu1 %210 }
 0x16a   :  { %v967_v31 = vpop.eup %966 }
 0x16b   :  { %v123_v32 = vmul.f32 %v967_v31, %v107_v6  ;;  %v213_v44 = vpop.permute.xlu1 %212 }
 0x16d   :  { %v129_v36 = vmul.f32 %v787_v33, %v123_v32 }
 0x16e   :  { %v969_v34 = vpop.eup %968 }
 0x16f   :  { %v124_v35 = vmul.f32 %v969_v34, %v108_v10  ;;  %v135_v39 = vadd.f32 %v788_v37, %v129_v36  ;;  %v217_v47 = vpop.permute.xlu1 %216 }
 0x171   :  { %v130_v38 = vmul.f32 %v787_v33, %v124_v35 }
 0x173   :  { %v136_v40 = vadd.f32 %v788_v37, %v130_v38  ;;  %v221_v55 = vpop.permute.xlu1 %220 }
 0x175   :  { %v137_v41 = vpack.c.bf16 %v136_v40, %v135_v39 }
 0x177   :  { %854 = vmatmul.mubr.msk.bf16.vlgmr.msra.gmra.mrb[0].mxu0 %vm97_vm0, %v137_v41 }
 0x24a   :  { %v191_v49 = vpop.f32.mrb[0].mxu0 }
 0x24b   :  { %v1204_v50 = vadd.f32 %v789_v46, %v191_v49  ;;  %v855_v51 = vpop.f32.mrb[1].mxu0 }
 0x24c   :  { %v194_v52 = vpop.f32.mrb[2].mxu0 }
 0x24d   :  { %v1206_v53 = vadd.f32 %v789_v46, %v194_v52  ;;  %v856_v54 = vpop.f32.mrb[3].mxu0  ;;  %v232_v56 = vmul.f32 %v211_v43, %v1204_v50  ;;  %v230_v58 = vmul.f32 %v207_v45, %v1204_v50  ;;  %v236_v3 = vmul.f32 %v219_v60, %v1204_v50 }
 0x24e   :  { %v234_v4 = vmul.f32 %v215_v48, %v1204_v50  ;;  %v928_v43 = vpack.c.bf16 %v1179_v17, %v1181_v18  ;;  %v932_v52 = vpack.c.bf16 %v1191_v21, %v1185_v19 }
 0x24f   :  { %v233_v57 = vmul.f32 %v213_v44, %v1206_v53  ;;  %v231_v59 = vmul.f32 %v209_v42, %v1206_v53  ;;  %v237_v61 = vmul.f32 %v221_v55, %v1206_v53  ;;  %v235_v2 = vmul.f32 %v217_v47, %v1206_v53 }
 0x250   :  { %v278_v16 = vpack.c.bf16 %v1206_v53, %v1204_v50  ;;  %929 = vmatprep.subr.bf16.mxu0 %v928_v43 }
 0x251   :  { %v239_v62 = vpack.c.bf16 %v233_v57, %v232_v56  ;;  %v238_v63 = vpack.c.bf16 %v231_v59, %v230_v58  ;;  %v241_v5 = vpack.c.bf16 %v237_v61, %v236_v3  ;;  %v240_v6 = vpack.c.bf16 %v235_v2, %v234_v4  ;;  %931 = vmatpush3.bf16.msra.mxu0 %v928_v43  ;;  %v958_v2 = vld [vmem:[#allocation5 + $0x10] sm:$0xff]   ;;  %v959_v3 = vld [vmem:[#allocation5 + $0x18] sm:$0xff]   ;;  %v960_v43 = vld [vmem:[#allocation5 + $0x20] sm:$0xff]  }
 0x252   :  { %933 = vmatprep.subr.bf16.mxu0 %v932_v52  ;;  %v936_v56 = vpack.c.bf16 %v1197_v23, %v1187_v20 }
 0x253   :  { %285 = vrot.lane.b32.xlu1 %v239_v62, %s1094_s24  ;;  %283 = vrot.lane.b32.xlu0 %v238_v63, %s1094_s24 }
 0x255   :  { %935 = vmatpush3.bf16.msra.mxu0 %v932_v52 }
 0x256   :  { %937 = vmatprep.subr.bf16.mxu0 %v936_v56 }
 0x257   :  { %287 = vrot.lane.b32.xlu0 %v240_v6, %s1094_s24  ;;  %289 = vrot.lane.b32.xlu1 %v241_v5, %s1094_s24 }
 0x259   :  { %939 = vmatpush3.bf16.msra.mxu0 %v936_v56 }
 0x25b   :  { %242 = vrot.lane.b32.xlu0 %v1181_v18, %s1085_s22  ;;  %244 = vrot.lane.b32.xlu1 %v1179_v17, %s1085_s22 }
 0x25f   :  { %246 = vrot.lane.b32.xlu0 %v1185_v19, %s1085_s22  ;;  %248 = vrot.lane.b32.xlu1 %v1191_v21, %s1085_s22  ;;  %v940_v19 = vpack.c.bf16 %v1200_v24, %v1193_v22 }
 0x261   :  { %941 = vmatprep.subr.bf16.mxu0 %v940_v19 }
 0x262   :  { %943 = vmatpush3.bf16.msra.mxu0 %v940_v19  ;;  %v802_v19 = vld [vmem:[#allocation7 + $0x3] ss:$0 sm:$0xff] }
 0x263   :  { %250 = vrot.lane.b32.xlu0 %v1187_v20, %s1085_s22  ;;  %252 = vrot.lane.b32.xlu1 %v1197_v23, %s1085_s22 }
 0x264   :  { %888 = vmatprep.subr.bf16.mxu0 %v1091_v15 }
 0x267   :  { %254 = vrot.lane.b32.xlu0 %v1193_v22, %s1085_s22  ;;  %256 = vrot.lane.b32.xlu1 %v1200_v24, %s1085_s22 }
 0x2c5   :  { %v284_v7 = vpop.permute.xlu0 %283  ;;  %v286_v9 = vpop.permute.xlu1 %285 }
 0x2c6   :  { %v295_v8 = vsel %vm97_vm0, %v284_v7, 0  ;;  %v298_v10 = vsel %vm97_vm0, %v286_v9, 0 }
 0x2c7   :  { %858 = vmatpush3.bf16.xpose.msra.mxu1 %v295_v8 }
 0x2c8   :  { %859 = vmatprep.subr.bf16.mxu1 %v1091_v15 }
 0x2c9   :  { %v288_v11 = vpop.permute.xlu0 %287  ;;  %v290_v13 = vpop.permute.xlu1 %289 }
 0x2ca   :  { %v301_v12 = vsel %vm97_vm0, %v288_v11, 0  ;;  %v304_v14 = vsel %vm97_vm0, %v290_v13, 0 }
 0x2cd   :  { %v245_v26 = vpop.permute.xlu1 %244  ;;  %v243_v27 = vpop.permute.xlu0 %242 }
 0x2ce   :  { %v267_v46 = vmul.f32 %v245_v26, %v1206_v53  ;;  %v266_v47 = vmul.f32 %v243_v27, %v1204_v50 }
 0x2cf   :  { %860 = vmatpush3.bf16.xpose.msra.mxu1 %v298_v10 }
 0x2d0   :  { %861 = vmatprep.subr.bf16.mxu1 %v1091_v15  ;;  %v274_v54 = vpack.c.bf16 %v267_v46, %v266_v47 }
 0x2d1   :  { %v249_v37 = vpop.permute.xlu1 %248  ;;  %v247_v38 = vpop.permute.xlu0 %246 }
 0x2d2   :  { %v269_v41 = vmul.f32 %v249_v37, %v1206_v53  ;;  %v268_v42 = vmul.f32 %v247_v38, %v1204_v50 }
 0x2d4   :  { %v275_v51 = vpack.c.bf16 %v269_v41, %v268_v42 }
 0x2d5   :  { %v253_v39 = vpop.permute.xlu1 %252  ;;  %v251_v40 = vpop.permute.xlu0 %250 }
 0x2d6   :  { %v271_v17 = vmul.f32 %v253_v39, %v1206_v53  ;;  %v270_v18 = vmul.f32 %v251_v40, %v1204_v50 }
 0x2d7   :  { %862 = vmatpush3.bf16.xpose.msra.mxu1 %v301_v12 }
 0x2d8   :  { %863 = vmatprep.subr.bf16.mxu1 %v1091_v15  ;;  %v276_v21 = vpack.c.bf16 %v271_v17, %v270_v18  ;;  %v801_v18 = vld [vmem:[#allocation7 + $0x2] ss:$0 sm:$0xff] }
 0x2d9   :  { %v257_v44 = vpop.permute.xlu1 %256  ;;  %v255_v45 = vpop.permute.xlu0 %254 }
 0x2da   :  { %v273_v48 = vmul.f32 %v257_v44, %v1206_v53  ;;  %v272_v49 = vmul.f32 %v255_v45, %v1204_v50  ;;  %v961_v44 = vld [vmem:[#allocation5 + $0x28] sm:$0xff]  }
 0x2dc   :  { %v277_v55 = vpack.c.bf16 %v273_v48, %v272_v49 }
 0x2df   :  { %864 = vmatpush3.bf16.xpose.msra.mxu1 %v304_v14 }
 0x2e0   :  { %900 = vmatprep.subr.bf16.mxu1 %v1091_v15 }
 0x2e6   :  { %866 = vmatmul.mubr.msk.bf16.vlgmr.msra.gmra.mrb[0].mxu1 %vm97_vm0, %v278_v16  ;;  %v797_v16 = vld [vmem:[#allocation7 + $0x5] ss:$0 sm:$0xff] }
 0x2e7   :  { %904 = vmatprep.mubr.msk.bf16.mxu1 %vm1092_vm1, %v1091_v15  ;;  %901 = vmatpush3.bf16.msra.mxu1 %v958_v2 }
 0x2e8   :  { %902 = vmatprep.subr.bf16.mxu1 %v1091_v15 }
 0x2eb   :  { %903 = vmatpush3.bf16.msra.mxu1 %v959_v3 }
 0x2ec   :  { %916 = vmatprep.subr.bf16.mxu1 %v1091_v15 }
 0x3b9   :  { %v340_v28 = vpop.f32.mrb[0].mxu1 }
 0x3ba   :  { %v341_v30 = vadd.f32 %v340_v28, %v67_v25  ;;  %v867_v31 = vpop.f32.mrb[1].mxu1 }
 0x3bb   :  { %v343_v32 = vpop.f32.mrb[2].mxu1 }
 0x3bc   :  { %v344_v33 = vadd.f32 %v343_v32, %v68_v29  ;;  %v868_v34 = vpop.f32.mrb[3].mxu1  ;;  %v348_v35 = vsel %vm347_vm2, %v341_v30, -inf }
 0x3bd   :  { %349 = vmax.xlane.f32.xlu0 %v348_v35 }
 0x3be   :  { %v351_v36 = vsel %vm347_vm2, %v344_v33, -inf }
 0x3bf   :  { %352 = vmax.xlane.f32.xlu1 %v351_v36 }
 0x3d0   :  { %448 = vrot.lane.b32.xlu1 %v275_v51, %s1085_s22 }
 0x3d3   :  { %446 = vrot.lane.b32.xlu0 %v274_v54, %s1085_s22 }
 0x3d4   :  { %452 = vrot.lane.b32.xlu1 %v277_v55, %s1085_s22 }
 0x3d7   :  { %450 = vrot.lane.b32.xlu0 %v276_v21, %s1085_s22 }
 0x44a   :  { %v350_v50 = vpop.xlane.xlu0 %349 }
 0x44b   :  { %v354_v53 = vsub.f32 %v341_v30, %v350_v50 }
 0x44c   :  { %v353_v57 = vpop.xlane.xlu1 %352 }
 0x44d   :  { %v356_v20 = vmul.f32 1.442695, %v354_v53  ;;  %v355_v23 = vsub.f32 %v344_v33, %v353_v57 }
 0x44e   :  { %v447_v24 = vpop.permute.xlu0 %446 }
 0x44f   :  { %970 = vpow2.f32 %v356_v20  ;;  %v358_v58 = vmul.f32 1.442695, %v355_v23  ;;  %v962_v20 = vld [vmem:[#allocation5 + $0x30] sm:$0xff]   ;;  %v963_v23 = vld [vmem:[#allocation5 + $0x38] sm:$0xff]  }
 0x450   :  { %v449_v60 = vpop.permute.xlu1 %448 }
 0x451   :  { %972 = vpow2.f32 %v358_v58  ;;  %v964_v58 = vld [vmem:[#allocation5 + $0x40] sm:$0xff]  }
 0x452   :  { %v451_v61 = vpop.permute.xlu0 %450 }
 0x454   :  { %v453_v62 = vpop.permute.xlu1 %452 }
 0x459   :  { %v971_v59 = vpop.eup %970 }
 0x45a   :  { %885 = vmatprep.mubr.msk.f32.mxu0 %vm347_vm2, %v971_v59 }
 0x45b   :  { %v973_v22 = vpop.eup %972 }
 0x45c   :  { %886 = vmatmul.mubr.msk.f32.vlgmr.msra.gmra.mrb[4].mxu0 %vm347_vm2, %v973_v22  ;;  %v441_v63 = vpack.c.bf16 %v973_v22, %v971_v59  ;;  %v965_v59 = vld [vmem:[#allocation5 + $0x48] sm:$0xff]   ;;  %v803_v22 = vld [vmem:[#allocation7 + $0x6] ss:$0 sm:$0xff] }
 0x45d   :  { %889 = vmatpush3.bf16.msra.mxu0 %v447_v24  ;;  %896 = vmatprep.mubr.msk.bf16.mxu0 %vm1092_vm1, %v1091_v15 }
 0x45e   :  { %890 = vmatprep.subr.bf16.mxu0 %v1091_v15 }
 0x461   :  { %891 = vmatpush3.bf16.msra.mxu0 %v449_v60 }
 0x462   :  { %892 = vmatprep.subr.bf16.mxu0 %v1091_v15 }
 0x465   :  { %893 = vmatpush3.bf16.msra.mxu0 %v451_v61 }
 0x466   :  { %894 = vmatprep.subr.bf16.mxu0 %v1091_v15 }
 0x469   :  { %895 = vmatpush3.bf16.msra.mxu0 %v453_v62 }
 0x46a   :  { %908 = vmatprep.subr.bf16.mxu0 %v1091_v15 }
 0x46c   :  { %897 = vmatmul.mubr.msk.bf16.vlgmr.msra.gmra.mrb[8].mxu0 %vm347_vm2, %v441_v63 }
 0x46d   :  { %912 = vmatprep.mubr.msk.bf16.mxu0 %vm1092_vm1, %v1091_v15  ;;  %909 = vmatpush3.bf16.msra.mxu0 %v960_v43 }
 0x46e   :  { %910 = vmatprep.subr.bf16.mxu0 %v1091_v15 }
 0x471   :  { %911 = vmatpush3.bf16.msra.mxu0 %v961_v44 }
 0x52f   :  { %v887_v4 = vpop.f32.mrb[4].mxu0 }
 0x530   :  { %v432_v5 = vpop.f32.mrb[5].mxu0 }
 0x531   :  { %974 = vrcp.f32 %v432_v5 }
 0x532   :  { %976 = vrcp.f32 %v887_v4 }
 0x53b   :  { %v975_v6 = vpop.eup %974 }
 0x53c   :  { %v977_v10 = vpop.eup %976 }
 0x53f   :  { %v495_v7 = vpop.f32.mrb[8].mxu0 }
 0x540   :  { %v503_v8 = vmul.f32 %v975_v6, %v495_v7  ;;  %v898_v9 = vpop.f32.mrb[9].mxu0 }
 0x541   :  { %v498_v11 = vpop.f32.mrb[10].mxu0 }
 0x542   :  { %v505_v12 = vmul.f32 %v977_v10, %v498_v11  ;;  %v899_v13 = vpop.f32.mrb[11].mxu0 }
 0x544   :  { %v506_v14 = vpack.c.bf16 %v505_v12, %v503_v8 }
 0x546   :  { %905 = vmatmul.mubr.msk.bf16.vlgmr.msra.gmra.mrb[4].mxu1 %vm97_vm0, %v506_v14 }
 0x547   :  { %924 = vmatprep.mubr.msk.bf16.mxu1 %vm1092_vm1, %v1091_v15  ;;  %917 = vmatpush3.bf16.msra.mxu1 %v962_v20 }
 0x548   :  { %918 = vmatprep.subr.bf16.mxu1 %v1091_v15 }
 0x54b   :  { %919 = vmatpush3.bf16.msra.mxu1 %v963_v23 }
 0x54c   :  { %920 = vmatprep.subr.bf16.mxu1 %v1091_v15 }
 0x54f   :  { %921 = vmatpush3.bf16.msra.mxu1 %v964_v58 }
 0x550   :  { %922 = vmatprep.subr.bf16.mxu1 %v1091_v15 }
 0x553   :  { %923 = vmatpush3.bf16.msra.mxu1 %v965_v59 }
 0x619   :  { %v560_v25 = vpop.f32.mrb[4].mxu1 }
 0x61a   :  { %v561_v26 = vadd.f32 %v797_v16, %v560_v25  ;;  %v906_v27 = vpop.f32.mrb[5].mxu1 }
 0x61b   :  { %v563_v28 = vpop.f32.mrb[6].mxu1 }
 0x61c   :  { %v1285_v29 = vadd.f32 %v561_v26, %v1160_v0  ;;  %v564_v30 = vadd.f32 %v797_v16, %v563_v28  ;;  %v907_v31 = vpop.f32.mrb[7].mxu1  ;;  %v809_v26 = vld [vmem:[#allocation7 + $0x7] ss:$0 sm:$0xff] }
 0x61e   :  { %v1288_v32 = vadd.f32 %v564_v30, %v1162_v1  ;;  %v569_v33 = vsel %vm97_vm0, %v1285_v29, 0.0 }
 0x61f   :  { %570 = vadd.xlane.f32.xlu0 %v569_v33 }
 0x620   :  { %v572_v34 = vsel %vm97_vm0, %v1288_v32, 0.0 }
 0x621   :  { %573 = vadd.xlane.f32.xlu1 %v572_v34 }
 0x6ac   :  { %v571_v35 = vpop.xlane.xlu0 %570 }
 0x6ad   :  { %v575_v36 = vmul.f32 0.03125, %v571_v35 }
 0x6ae   :  { %v574_v37 = vpop.xlane.xlu1 %573 }
 0x6af   :  { %v577_v38 = vsub.f32 %v1285_v29, %v575_v36  ;;  %v576_v0 = vmul.f32 0.03125, %v574_v37 }
 0x6b1   :  { %v578_v39 = vsub.f32 %v1288_v32, %v576_v0  ;;  %v579_v40 = vmul.f32 %v577_v38, %v577_v38 }
 0x6b3   :  { %v581_v1 = vsel %vm97_vm0, %v579_v40, 0.0  ;;  %v580_v41 = vmul.f32 %v578_v39, %v578_v39 }
 0x6b4   :  { %582 = vadd.xlane.f32.xlu0 %v581_v1 }
 0x6b5   :  { %v584_v42 = vsel %vm97_vm0, %v580_v41, 0.0 }
 0x6b8   :  { %585 = vadd.xlane.f32.xlu0 %v584_v42 }
 0x741   :  { %v583_v45 = vpop.xlane.xlu0 %582 }
 0x742   :  { %v587_v46 = vmul.f32 0.03125, %v583_v45 }
 0x744   :  { %v589_v47 = vadd.f32 1e-05, %v587_v46 }
 0x745   :  { %v586_v48 = vpop.xlane.xlu0 %585 }
 0x746   :  { %978 = vrsqrt.f32 %v589_v47  ;;  %v588_v49 = vmul.f32 0.03125, %v586_v48 }
 0x748   :  { %v590_v51 = vadd.f32 1e-05, %v588_v49 }
 0x74a   :  { %980 = vrsqrt.f32 %v590_v51 }
 0x750   :  { %v979_v52 = vpop.eup %978 }
 0x751   :  { %v593_v17 = vmul.f32 %v979_v52, %v577_v38 }
 0x753   :  { %v599_v55 = vmul.f32 %v801_v18, %v593_v17 }
 0x754   :  { %v981_v54 = vpop.eup %980 }
 0x755   :  { %v594_v56 = vmul.f32 %v981_v54, %v578_v39  ;;  %v605_v50 = vadd.f32 %v802_v19, %v599_v55 }
 0x757   :  { %v600_v21 = vmul.f32 %v801_v18, %v594_v56 }
 0x759   :  { %v606_v53 = vadd.f32 %v802_v19, %v600_v21 }
 0x75b   :  { %v607_v57 = vpack.c.bf16 %v606_v53, %v605_v50 }
 0x75d   :  { %913 = vmatmul.mubr.msk.bf16.vlgmr.msra.gmra.mrb[12].mxu0 %vm97_vm0, %v607_v57 }
 0x830   :  { %v661_v24 = vpop.f32.mrb[12].mxu0 }
 0x831   :  { %v662_v60 = vadd.f32 %v803_v22, %v661_v24  ;;  %v914_v61 = vpop.f32.mrb[13].mxu0 }
 0x832   :  { %v664_v62 = vpop.f32.mrb[14].mxu0 }
 0x833   :  { %v665_v63 = vadd.f32 %v803_v22, %v664_v62  ;;  %684 = vrot.lane.b32.xlu0 %v662_v60, %s1085_s22  ;;  %v915_v2 = vpop.f32.mrb[15].mxu0  ;;  %v807_v3 = vmul.f32 -1.442695, %v662_v60 }
 0x835   :  { %686 = vrot.lane.b32.xlu1 %v665_v63, %s1085_s22  ;;  %v808_v4 = vmul.f32 -1.442695, %v665_v63  ;;  %982 = vpow2.f32 %v807_v3  ;;  %s1095_s22 = smov [#allocation8]  }
 0x836   :  { %s774_s25 = sshll.u32 %s1095_s22, 4  ;;  %s775_s25 = int_to_ptr.vmem [resolvable:$true] %s774_s25 }
 0x837   :  { %984 = vpow2.f32 %v808_v4  ;;  %s1056_s26 = scalar_lea.vmem %s775_s25, 256  ;;  %p1061_p11 = scmp.lt.s32.totalorder %s775_s25, %s775_s25 }
 0x838   :  { %p1057_p10 = scmp.ne.s32.totalorder %s775_s25, %s1056_s26  ;;  %p1062_p12 = scmp.lt.s32.totalorder %s1056_s26, %s1056_s26 }
 0x83a   :  { %p1063_p13 = por %p1062_p12, %p1061_p11 }
 0x83c   :  { %p1064_p0 = pnand %p1063_p13, %p1057_p10 }
 0x83f   :  { %v983_v5 = vpop.eup %982 }
 0x840   :  { %v674_v15 = vadd.f32 1.0, %v983_v5 }
 0x841   :  { %v985_v6 = vpop.eup %984 }
 0x842   :  { %v675_v7 = vadd.f32 1.0, %v985_v6  ;;  %986 = vrcp.f32 %v674_v15 }
 0x844   :  { %988 = vrcp.f32 %v675_v7 }
 0x84c   :  { %v987_v8 = vpop.eup %986 }
 0x84d   :  { %v680_v11 = vmul.f32 %v987_v8, %v662_v60 }
 0x84e   :  { %v989_v9 = vpop.eup %988 }
 0x84f   :  { %v681_v12 = vmul.f32 %v989_v9, %v665_v63 }
 0x8a5   :  { %v685_v10 = vpop.permute.xlu0 %684 }
 0x8a6   :  { %v690_v14 = vmul.f32 %v685_v10, %v680_v11 }
 0x8a7   :  { %v687_v13 = vpop.permute.xlu1 %686 }
 0x8a8   :  { %v691_v16 = vmul.f32 %v687_v13, %v681_v12 }
 0x8aa   :  { %v692_v25 = vpack.c.bf16 %v691_v16, %v690_v14 }
 0x8ac   :  { %925 = vmatmul.mubr.msk.bf16.vlgmr.msra.gmra.mrb[8].mxu1 %vm347_vm2, %v692_v25 }
 0x97f   :  { %v758_v27 = vpop.f32.mrb[8].mxu1 }
 0x980   :  { %v759_v28 = vadd.f32 %v809_v26, %v758_v27  ;;  %v926_v30 = vpop.f32.mrb[9].mxu1 }
 0x981   :  { %v761_v31 = vpop.f32.mrb[10].mxu1 }
 0x982   :  { %v765_v33 = vadd.f32 %v759_v28, %v1285_v29  ;;  %v762_v34 = vadd.f32 %v809_v26, %v761_v31  ;;  %v927_v35 = vpop.f32.mrb[11].mxu1 }
 0x984   :  { %767 = vst.msk [vmem:[#allocation8] sm:$0xff] %vm97_vm0, %v765_v33  ;;  %v766_v36 = vadd.f32 %v762_v34, %v1288_v32 }
 0x986   :  { %768 = vst.msk [vmem:[#allocation8 + $0x8] sm:$0xff] %vm97_vm0, %v766_v36 }
 0x987   :  { %1067 = shalt.err (!%p1064_p0)
}
 0x988   :  { %s1068_s29 = scalar_lea.hbm %s1328_s3, 256 }
 0x989   :  { %p1069_p1 = scmp.ne.s32.totalorder %s1328_s3, %s1068_s29  ;;  %p1072_p2 = scmp.lt.u32.totalorder %s1068_s29, %s1328_s3 }
 0x98b   :  { %p1074_p3 = pnand %p1072_p2, %p1069_p1 }
 0x98d   :  { %1077 = shalt.err (!%p1074_p3)
}
 0x98e   :  { %780 = dma.vmem_to_hbm [thread:$0]  %s775_s25, 256, %s1328_s3, [#allocation4], %s1088_s1, %s1088_s1, %s1089_s9  }
 0x98f   :  { %1082 = dma.done.wait [#allocation4], 256  }
 0x990   :  { %1083 = vsyncadd [#allocation4], 4294967040 }
 0x991   :  { %784 = vsyncpa [#allocation3], 1 }
 0x992   :  { %785 = vsyncpa [#allocation6], 1 }
 0x993   :  { %786 = vsyncpa [#allocation4], 1 }

</bundles_post_ra>
